<compile_context>
chip_gen: v7x
topology: tpu7x:2x2x1
jax: 0.10.0
libtpu: 0.0.40
codegen_flags: <defaults>
</compile_context>

<pallas_src>
import functools
import math

import jax
import jax.numpy as jnp
from jax.experimental import pallas as pl
from jax.experimental.pallas import tpu as pltpu


_INV_SQRT2 = 1.0 / math.sqrt(2.0)


def _round_up(x: int, m: int) -> int:
    return (x + m - 1) // m * m


def _vmem_capacity_bytes() -> int:
    try:
        return int(pltpu.get_tpu_info().vmem_capacity_bytes)
    except Exception:
        return 64 * 1024 * 1024  # conservative fallback (v7x per-TC VMEM)


def _adapter_kernel(x_ref, w1_ref, b1_ref, w2_ref, b2_ref, o_ref, h_ref, *,
                    approximate_gelu: bool):
    # Grid = (m, n); n tiles the columns of w2 / b2 / out.
    # x_ref: (tm, D_in_p)  w1: (D_in_p, H_p)  b1: (1, H_p)
    # w2: (H_p, tn)        b2: (1, tn)        o: (tm, tn)   h: (tm, H_p)
    @pl.when(pl.program_id(1) == 0)
    def _():
        # First matmul + bias + GELU, computed once per M tile.
        h = jnp.dot(x_ref[...].astype(w1_ref.dtype), w1_ref[...],
                    preferred_element_type=jnp.float32)
        h = h + b1_ref[...]                       # f32 bias add (VPU)
        if approximate_gelu:
            h = jax.nn.gelu(h, approximate=True)  # tanh -> EUP slot
        else:
            # Exact erf GELU (torch.nn.GELU() default), f32 VALU polynomial.
            h = 0.5 * h * (1.0 + jax.lax.erf(h * _INV_SQRT2))
        h_ref[...] = h.astype(h_ref.dtype)

    out = jnp.dot(h_ref[...], w2_ref[...], preferred_element_type=jnp.float32)
    out = out + b2_ref[...]
    o_ref[...] = out.astype(o_ref.dtype)


def _choose_tiles(*, M, D_in_p, H_p, sub, x_it, w_it, o_it, budget, tm_hint,
                  tn_override=None):
    """Pick (tm, tn) so the estimated VMEM footprint fits the budget."""
    tm = max(sub, min(_round_up(tm_hint, sub), _round_up(M, sub)))

    if tn_override is not None:
        cands = [int(tn_override)]
    else:
        cands = sorted({t for t in (H_p, 4096, 2048, 1024, 512, 256, 128)
                        if t <= H_p and H_p % t == 0}, reverse=True)

    def need(tm_, tn_):
        grid_n = H_p // tn_
        w2_bufs = 1 if grid_n == 1 else 2          # Buffered(1) when resident
        return (D_in_p * H_p * w_it + H_p * 4       # resident w1 + b1 (1 buf)
                + 2 * tm_ * D_in_p * x_it            # x tiles (double-buffered)
                + w2_bufs * (H_p * tn_ * w_it + tn_ * 4)   # w2 + b2 slices
                + 2 * tm_ * tn_ * o_it               # out tiles
                + tm_ * H_p * w_it                   # hidden VMEM scratch (bf16)
                + tm_ * H_p * 4 + tm_ * tn_ * 4)     # in-kernel f32 temporaries

    while True:
        for tn_ in cands:
            if need(tm, tn_) <= budget:
                return tm, tn_, need(tm, tn_)
        if tm <= sub:
            tn_ = cands[-1]
            return tm, tn_, need(tm, tn_)
        tm = max(sub, _round_up(tm // 2, sub))


def prepare_image_adapter_params(w1, b1, w2, b2, *, matmul_dtype=jnp.bfloat16):
    """Pad (to 128-lane multiples) and cast the static adapter params ONCE."""
    D_in, D_out = w1.shape
    assert b1.shape == (D_out,)
    assert w2.shape == (D_out, D_out)
    assert b2.shape == (D_out,)
    D_in_p = _round_up(D_in, 128)
    H_p = _round_up(D_out, 128)
    if (D_in_p, H_p) != (D_in, D_out):
        w1 = jnp.pad(w1, ((0, D_in_p - D_in), (0, H_p - D_out)))
    if H_p != D_out:
        w2 = jnp.pad(w2, ((0, H_p - D_out), (0, H_p - D_out)))
        b1 = jnp.pad(b1, (0, H_p - D_out))
        b2 = jnp.pad(b2, (0, H_p - D_out))
    return {
        "w1": w1.astype(matmul_dtype),
        "b1": b1.reshape(1, H_p).astype(jnp.float32),
        "w2": w2.astype(matmul_dtype),
        "b2": b2.reshape(1, H_p).astype(jnp.float32),
        "d_in": D_in,
        "d_out": D_out,
    }


def image_adapter_apply(vision_outputs, params, *, tm=None, tn=None,
                        approximate_gelu: bool = True, out_dtype=None):
    """linear2(GELU(linear1(vision_outputs))) with pre-prepared params."""
    w1_p, b1_p, w2_p, b2_p = params["w1"], params["b1"], params["w2"], params["b2"]
    D_in, D_out = params["d_in"], params["d_out"]
    D_in_p, H_p = w1_p.shape
    matmul_dtype = w1_p.dtype

    lead = vision_outputs.shape[:-1]
    assert vision_outputs.shape[-1] == D_in
    M = 1
    for d in lead:
        M *= d
    out_dtype = vision_outputs.dtype if out_dtype is None else out_dtype

    x_it = jnp.dtype(vision_outputs.dtype).itemsize
    w_it = jnp.dtype(matmul_dtype).itemsize
    o_it = jnp.dtype(out_dtype).itemsize

    # --- tile selection, clamped to the real per-core VMEM capacity ----------
    capacity = _vmem_capacity_bytes()
    budget = max(capacity - (6 << 20), 16 << 20)
    sub = 8 if min(x_it, w_it, o_it) >= 4 else 16      # sublane quantum
    tm_hint = tm if tm is not None else (512 if capacity >= (96 << 20) else 256)
    tm_sel, tn_sel, need = _choose_tiles(
        M=M, D_in_p=D_in_p, H_p=H_p, sub=sub, x_it=x_it, w_it=w_it, o_it=o_it,
        budget=budget, tm_hint=tm_hint, tn_override=tn)

    M_pad = _round_up(M, tm_sel)
    grid_m = M_pad // tm_sel
    grid_n = H_p // tn_sel

    # x stays in its native dtype (in-kernel cast); pad only when needed.
    x2d = vision_outputs.reshape(M, D_in)
    if M_pad != M or D_in_p != D_in:
        x2d = jnp.pad(x2d, ((0, M_pad - M), (0, D_in_p - D_in)))

    vmem_limit = int(max(need + (2 << 20), 32 << 20))
    vmem_limit = int(min(vmem_limit, capacity - (2 << 20)))

    cost = pl.CostEstimate(
        flops=int(2 * M_pad * H_p * (D_in_p + H_p)),
        transcendentals=int(M_pad * H_p) if approximate_gelu else 0,
        bytes_accessed=int(x2d.size * x_it
                           + (w1_p.size + w2_p.size) * w_it
                           + (b1_p.size + b2_p.size) * 4
                           + M_pad * H_p * o_it),
    )

    # Constant-index weights: DMA'd once, single-buffered (no 2x VMEM).
    def _const_spec(shape):
        return pl.BlockSpec(shape, lambda i, n: (0, 0),
                            pipeline_mode=pl.Buffered(1))

    if grid_n == 1:
        w2_spec = pl.BlockSpec((H_p, tn_sel), lambda i, n: (0, n),
                               pipeline_mode=pl.Buffered(1))
        b2_spec = pl.BlockSpec((1, tn_sel), lambda i, n: (0, n),
                               pipeline_mode=pl.Buffered(1))
    else:
        # Streamed w2 column slices double-buffer against the second matmul.
        w2_spec = pl.BlockSpec((H_p, tn_sel), lambda i, n: (0, n))
        b2_spec = pl.BlockSpec((1, tn_sel), lambda i, n: (0, n))

    kernel = functools.partial(_adapter_kernel,
                               approximate_gelu=approximate_gelu)

    out2d = pl.pallas_call(
        kernel,
        out_shape=jax.ShapeDtypeStruct((M_pad, H_p), out_dtype),
        grid_spec=pltpu.PrefetchScalarGridSpec(
            num_scalar_prefetch=0,
            grid=(grid_m, grid_n),
            in_specs=[
                pl.BlockSpec((tm_sel, D_in_p), lambda i, n: (i, 0)),  # x tile
                _const_spec((D_in_p, H_p)),                           # w1
                _const_spec((1, H_p)),                                # b1
                w2_spec,                                              # w2 slice
                b2_spec,                                              # b2 slice
            ],
            out_specs=pl.BlockSpec((tm_sel, tn_sel), lambda i, n: (i, n)),
            scratch_shapes=[pltpu.VMEM((tm_sel, H_p), matmul_dtype)],
        ),
        compiler_params=pltpu.CompilerParams(
            dimension_semantics=("parallel", "arbitrary"),
            vmem_limit_bytes=vmem_limit,
        ),
        cost_estimate=cost,
    )(x2d, w1_p, b1_p, w2_p, b2_p)

    return out2d[:M, :D_out].reshape(*lead, D_out)


def image_adapter(vision_outputs, w1, b1, w2, b2, *,
                  matmul_dtype=jnp.bfloat16, **kwargs):
    """Convenience one-shot wrapper (prepares params on every call)."""
    params = prepare_image_adapter_params(w1, b1, w2, b2,
                                          matmul_dtype=matmul_dtype)
    return image_adapter_apply(vision_outputs, params, **kwargs)


def _init_params(key, input_features, output_features):
    # Deterministic synthetic init (same shapes as torch.nn.Linear params).
    k1, k2, k3, k4 = jax.random.split(key, 4)
    bound1 = 1.0 / math.sqrt(input_features)
    bound2 = 1.0 / math.sqrt(output_features)
    # Weights stored transposed relative to torch ((in, out)) so kernel does x @ W.
    w1 = jax.random.uniform(k1, (input_features, output_features),
                            minval=-bound1, maxval=bound1, dtype=jnp.float32)
    b1 = jax.random.uniform(k2, (output_features,),
                            minval=-bound1, maxval=bound1, dtype=jnp.float32)
    w2 = jax.random.uniform(k3, (output_features, output_features),
                            minval=-bound2, maxval=bound2, dtype=jnp.float32)
    b2 = jax.random.uniform(k4, (output_features,),
                            minval=-bound2, maxval=bound2, dtype=jnp.float32)
    return w1, b1, w2, b2


if __name__ == "__main__":
    key = jax.random.PRNGKey(0)
    kx, kp = jax.random.split(key)

    B, S = 2, 8
    input_features, output_features = 32, 32

    x = jax.random.normal(kx, (B, S, input_features), dtype=jnp.float32)
    w1, b1, w2, b2 = _init_params(kp, input_features, output_features)

    params = prepare_image_adapter_params(w1, b1, w2, b2)

    # Perf-default path (tanh GELU on the EUP slot).
    out_tanh = jax.block_until_ready(image_adapter_apply(x, params))
    # Exact-erf path (matches torch.nn.GELU() default semantics).
    out_erf = jax.block_until_ready(
        image_adapter_apply(x, params, approximate_gelu=False))

    # Plain-JAX references (f32).
    h = x @ w1 + b1
    ref_tanh = jax.nn.gelu(h, approximate=True) @ w2 + b2
    ref_erf = (0.5 * h * (1.0 + jax.lax.erf(h * _INV_SQRT2))) @ w2 + b2

    assert out_tanh.shape == (B, S, output_features)
    assert out_erf.shape == (B, S, output_features)
    # bf16 MXU operands with f32 accumulation -> relaxed tolerance vs f32 ref.
    assert jnp.allclose(out_tanh, ref_tanh, atol=2e-2, rtol=2e-2), \
        float(jnp.max(jnp.abs(out_tanh - ref_tanh)))
    assert jnp.allclose(out_erf, ref_erf, atol=2e-2, rtol=2e-2), \
        float(jnp.max(jnp.abs(out_erf - ref_erf)))

    print("KERNEL_OK")
</pallas_src>

<mosaic_0001>
module attributes {stable_mosaic.version = 11 : i64} {
  func.func @_adapter_kernel(%arg0: i32, %arg1: i32, %arg2: memref<16x128xf32, #tpu.memory_space<vmem>>, %arg3: memref<128x128xbf16, #tpu.memory_space<vmem>>, %arg4: memref<1x128xf32, #tpu.memory_space<vmem>>, %arg5: memref<128x128xbf16, #tpu.memory_space<vmem>>, %arg6: memref<1x128xf32, #tpu.memory_space<vmem>>, %arg7: memref<16x128xf32, #tpu.memory_space<vmem>>, %arg8: memref<16x128xbf16, #tpu.memory_space<vmem>>) attributes {dimension_semantics = [#tpu.dimension_semantics<parallel>, #tpu.dimension_semantics<arbitrary>], iteration_bounds = array<i64: 1, 1>, scalar_prefetch = 0 : i64, scratch_operands = 1 : i64, tpu.core_type = #tpu.core_type<tc>, window_params = [{transform_indices = @transform_0, window_bounds = array<i64: 16, 128>}, {pipeline_mode = #tpu.pipeline_mode<synchronous>, transform_indices = @transform_1, window_bounds = array<i64: 128, 128>}, {pipeline_mode = #tpu.pipeline_mode<synchronous>, transform_indices = @transform_2, window_bounds = array<i64: 1, 128>}, {pipeline_mode = #tpu.pipeline_mode<synchronous>, transform_indices = @transform_3, window_bounds = array<i64: 128, 128>}, {pipeline_mode = #tpu.pipeline_mode<synchronous>, transform_indices = @transform_4, window_bounds = array<i64: 1, 128>}, {transform_indices = @transform_5, window_bounds = array<i64: 16, 128>}]} {
    %c0_i32 = arith.constant 0 : i32
    %0 = arith.cmpi eq, %arg1, %c0_i32 : i32
    %1 = arith.extui %0 : i1 to i32
    %c0_i32_0 = arith.constant 0 : i32
    %2 = arith.cmpi ne, %1, %c0_i32_0 : i32
    scf.if %2 {
      %c0_8 = arith.constant 0 : index
      %c0_9 = arith.constant 0 : index
      %10 = vector.load %arg2[%c0_8, %c0_9] : memref<16x128xf32, #tpu.memory_space<vmem>>, vector<16x128xf32>
      %11 = arith.truncf %10 : vector<16x128xf32> to vector<16x128xbf16>
      %c0_10 = arith.constant 0 : index
      %c0_11 = arith.constant 0 : index
      %12 = vector.load %arg3[%c0_10, %c0_11] : memref<128x128xbf16, #tpu.memory_space<vmem>>, vector<128x128xbf16>
      %cst_12 = arith.constant dense<0.000000e+00> : vector<16x128xf32>
      %13 = tpu.matmul %11, %12, %cst_12 {dimension_numbers = #tpu.dot_dimension_numbers<[1], [0], [0], [1], [0, 0, 1, 1], [], []>} : vector<16x128xbf16>, vector<128x128xbf16>, vector<16x128xf32> -> vector<16x128xf32>
      %c0_13 = arith.constant 0 : index
      %c0_14 = arith.constant 0 : index
      %14 = vector.load %arg4[%c0_13, %c0_14] : memref<1x128xf32, #tpu.memory_space<vmem>>, vector<1x128xf32>
      %15 = vector.broadcast %14 : vector<1x128xf32> to vector<16x128xf32>
      %16 = arith.addf %13, %15 : vector<16x128xf32>
      %17 = arith.mulf %16, %16 : vector<16x128xf32>
      %18 = arith.mulf %16, %17 : vector<16x128xf32>
      %cst_15 = arith.constant 4.471500e-02 : f32
      %19 = vector.broadcast %cst_15 : f32 to vector<16x128xf32>
      %20 = arith.mulf %19, %18 : vector<16x128xf32>
      %21 = arith.addf %16, %20 : vector<16x128xf32>
      %cst_16 = arith.constant 0.797884583 : f32
      %22 = vector.broadcast %cst_16 : f32 to vector<16x128xf32>
      %23 = arith.mulf %22, %21 : vector<16x128xf32>
      %24 = math.tanh %23 : vector<16x128xf32>
      %cst_17 = arith.constant 1.000000e+00 : f32
      %25 = vector.broadcast %cst_17 : f32 to vector<16x128xf32>
      %26 = arith.addf %25, %24 : vector<16x128xf32>
      %cst_18 = arith.constant 5.000000e-01 : f32
      %27 = vector.broadcast %cst_18 : f32 to vector<16x128xf32>
      %28 = arith.mulf %27, %26 : vector<16x128xf32>
      %29 = arith.mulf %16, %28 : vector<16x128xf32>
      %30 = arith.truncf %29 : vector<16x128xf32> to vector<16x128xbf16>
      %c0_19 = arith.constant 0 : index
      %c0_20 = arith.constant 0 : index
      %31 = vector.load %arg8[%c0_19, %c0_20] : memref<16x128xbf16, #tpu.memory_space<vmem>>, vector<16x128xbf16>
      tpu.vector_store %arg8[%c0_19, %c0_20], %30 {strides = array<i32>} : memref<16x128xbf16, #tpu.memory_space<vmem>>, vector<16x128xbf16>,
    } else {
    }
    %c0 = arith.constant 0 : index
    %c0_1 = arith.constant 0 : index
    %3 = vector.load %arg8[%c0, %c0_1] : memref<16x128xbf16, #tpu.memory_space<vmem>>, vector<16x128xbf16>
    %c0_2 = arith.constant 0 : index
    %c0_3 = arith.constant 0 : index
    %4 = vector.load %arg5[%c0_2, %c0_3] : memref<128x128xbf16, #tpu.memory_space<vmem>>, vector<128x128xbf16>
    %cst = arith.constant dense<0.000000e+00> : vector<16x128xf32>
    %5 = tpu.matmul %3, %4, %cst {dimension_numbers = #tpu.dot_dimension_numbers<[1], [0], [0], [1], [0, 0, 1, 1], [], []>} : vector<16x128xbf16>, vector<128x128xbf16>, vector<16x128xf32> -> vector<16x128xf32>
    %c0_4 = arith.constant 0 : index
    %c0_5 = arith.constant 0 : index
    %6 = vector.load %arg6[%c0_4, %c0_5] : memref<1x128xf32, #tpu.memory_space<vmem>>, vector<1x128xf32>
    %7 = vector.broadcast %6 : vector<1x128xf32> to vector<16x128xf32>
    %8 = arith.addf %5, %7 : vector<16x128xf32>
    %c0_6 = arith.constant 0 : index
    %c0_7 = arith.constant 0 : index
    %9 = vector.load %arg7[%c0_6, %c0_7] : memref<16x128xf32, #tpu.memory_space<vmem>>, vector<16x128xf32>
    tpu.vector_store %arg7[%c0_6, %c0_7], %8 {strides = array<i32>} : memref<16x128xf32, #tpu.memory_space<vmem>>, vector<16x128xf32>,
    return
  }
  func.func @transform_0(%arg0: i32, %arg1: i32) -> (i32, i32) {
    %c0_i32 = arith.constant 0 : i32
    %c0_i32_0 = arith.constant 0 : i32
    return %arg0, %c0_i32 : i32, i32
  }
  func.func @transform_1(%arg0: i32, %arg1: i32) -> (i32, i32) {
    %c0_i32 = arith.constant 0 : i32
    %c0_i32_0 = arith.constant 0 : i32
    %c0_i32_1 = arith.constant 0 : i32
    return %c0_i32, %c0_i32_0 : i32, i32
  }
  func.func @transform_2(%arg0: i32, %arg1: i32) -> (i32, i32) {
    %c0_i32 = arith.constant 0 : i32
    %c0_i32_0 = arith.constant 0 : i32
    %c0_i32_1 = arith.constant 0 : i32
    return %c0_i32, %c0_i32_0 : i32, i32
  }
  func.func @transform_3(%arg0: i32, %arg1: i32) -> (i32, i32) {
    %c0_i32 = arith.constant 0 : i32
    %c0_i32_0 = arith.constant 0 : i32
    return %c0_i32, %arg1 : i32, i32
  }
  func.func @transform_4(%arg0: i32, %arg1: i32) -> (i32, i32) {
    %c0_i32 = arith.constant 0 : i32
    %c0_i32_0 = arith.constant 0 : i32
    return %c0_i32, %arg1 : i32, i32
  }
  func.func @transform_5(%arg0: i32, %arg1: i32) -> (i32, i32) {
    %c0_i32 = arith.constant 0 : i32
    return %arg0, %arg1 : i32, i32
  }
}

</mosaic_0001>

<bundles_post_ra>
// kernel: tpu_custom_call.1
= control target key start
LH: loop header
LB: loop body
LE: loop exit
PB: predicated region body
PF: predicated region fallthrough
CT: control target
= control target key end

     0   :  { %10 = vsyncpa [#allocation4], 0  ;;  %s641_s0 = inlined_call_operand.hbm [shape: f32[16,128], index: 0, kind: input, shape index: {}]   ;;  %s642_s1 = inlined_call_operand.hbm [shape: bf16[128,128], index: 1, kind: input, shape index: {}]   ;;  %s643_s2 = inlined_call_operand.vmem [shape: f32[1,128], index: 2, kind: input, shape index: {}]   ;;  %s644_s3 = inlined_call_operand.hbm [shape: bf16[128,128], index: 3, kind: input, shape index: {}]   ;;  %s645_s4 = inlined_call_operand.vmem [shape: f32[1,128], index: 4, kind: input, shape index: {}]   ;;  %s646_s5 = inlined_call_operand.hbm [shape: f32[16,128], index: 5, kind: output, shape index: {}]  }
   0x1   :  { %11 = vsyncpa [#allocation7], 0 }
   0x2   :  { %12 = vsyncpa [#allocation5], 0  ;;  %s535_s18 = smov [#allocation6]   ;;  %s441_s22 = scalar_lea.hbm %s642_s1, 1024 }
   0x3   :  { %s30_s19 = sshll.u32 %s535_s18, 4  ;;  %p442_p0 = scmp.ne.s32.totalorder %s642_s1, %s441_s22  ;;  %s31_s19 = int_to_ptr.vmem [resolvable:$true] %s30_s19 }
   0x4   :  { %p445_p1 = scmp.lt.u32.totalorder %s441_s22, %s642_s1 }
   0x6   :  { %p447_p2 = pnand %p445_p1, %p442_p0 }
   0x8   :  { %450 = shalt.err (!%p447_p2)
}
   0x9   :  { %s451_s27 = scalar_lea.vmem %s31_s19, 1024  ;;  %p456_p4 = scmp.lt.s32.totalorder %s31_s19, %s31_s19 }
   0xa   :  { %p452_p3 = scmp.ne.s32.totalorder %s31_s19, %s451_s27  ;;  %p457_p5 = scmp.lt.s32.totalorder %s451_s27, %s451_s27 }
   0xc   :  { %p458_p6 = por %p457_p5, %p456_p4 }
   0xe   :  { %p459_p7 = pnand %p458_p6, %p452_p3 }
  0x10   :  { %462 = shalt.err (!%p459_p7)
}
  0x11   :  { %s536_s28 = smov 64   ;;  %s537_s29 = smov 4  }
  0x12   :  { %36 = dma.hbm_to_vmem [thread:$0]  %s642_s1, 1024, %s31_s19, [#allocation7], %s536_s28, %s536_s28, %s537_s29  }
  0x13   :  { %s538_s7 = smov [#allocation3]   ;;  %s463_s11 = scalar_lea.hbm %s641_s0, 256 }
  0x14   :  { %s18_s8 = sshll.u32 %s538_s7, 4  ;;  %p464_p8 = scmp.ne.s32.totalorder %s641_s0, %s463_s11  ;;  %s19_s8 = int_to_ptr.vmem [resolvable:$true] %s18_s8 }
  0x15   :  { %p467_p9 = scmp.lt.u32.totalorder %s463_s11, %s641_s0 }
  0x17   :  { %p469_p10 = pnand %p467_p9, %p464_p8 }
  0x19   :  { %472 = shalt.err (!%p469_p10)
}
  0x1a   :  { %s473_s16 = scalar_lea.vmem %s19_s8, 256  ;;  %p478_p12 = scmp.lt.s32.totalorder %s19_s8, %s19_s8 }
  0x1b   :  { %p474_p11 = scmp.ne.s32.totalorder %s19_s8, %s473_s16  ;;  %p479_p13 = scmp.lt.s32.totalorder %s473_s16, %s473_s16 }
  0x1d   :  { %p480_p0 = por %p479_p13, %p478_p12 }
  0x1f   :  { %p481_p1 = pnand %p480_p0, %p474_p11 }
  0x21   :  { %484 = shalt.err (!%p481_p1)
}
  0x22   :  { %s539_s1 = smov 128   ;;  %s540_s17 = smov 8  }
  0x23   :  { %24 = dma.hbm_to_vmem [thread:$0]  %s641_s0, 256, %s19_s8, [#allocation4], %s539_s1, %s539_s1, %s540_s17  }
  0x24   :  { %s541_s20 = smov [#allocation8]   ;;  %s485_s24 = scalar_lea.hbm %s644_s3, 1024 }
  0x25   :  { %s44_s21 = sshll.u32 %s541_s20, 4  ;;  %p486_p2 = scmp.ne.s32.totalorder %s644_s3, %s485_s24  ;;  %s45_s21 = int_to_ptr.vmem [resolvable:$true] %s44_s21 }
  0x26   :  { %p489_p3 = scmp.lt.u32.totalorder %s485_s24, %s644_s3 }
  0x28   :  { %p491_p4 = pnand %p489_p3, %p486_p2 }
  0x2a   :  { %494 = shalt.err (!%p491_p4)
}
  0x2b   :  { %s495_s6 = scalar_lea.vmem %s45_s21, 1024  ;;  %p500_p6 = scmp.lt.s32.totalorder %s45_s21, %s45_s21 }
  0x2c   :  { %p496_p5 = scmp.ne.s32.totalorder %s45_s21, %s495_s6  ;;  %p501_p7 = scmp.lt.s32.totalorder %s495_s6, %s495_s6 }
  0x2e   :  { %p502_p8 = por %p501_p7, %p500_p6 }
  0x30   :  { %p503_p9 = pnand %p502_p8, %p496_p5 }
  0x32   :  { %506 = shalt.err (!%p503_p9)
}
  0x33   :  { %50 = dma.hbm_to_vmem [thread:$0]  %s644_s3, 1024, %s45_s21, [#allocation7], %s536_s28, %s536_s28, %s537_s29  }
  0x34   :  { %529 = dma.done.wait [#allocation4], 256  }
  0x35   :  { %530 = vsyncadd [#allocation4], 4294967040 }
  0x36   :  { %531 = dma.done.wait [#allocation7], 2048  }
  0x37   :  { %532 = vsyncadd [#allocation7], 4294965248  ;;  %v542_v0 = vmov 0.0   ;;  %vm543_vm0 = vmmov 0   ;;  %v421_v1 = vld [vmem:[#allocation6] sm:$0xff]   ;;  %v422_v2 = vld [vmem:[#allocation6 + $0x8] sm:$0xff]  }
  0x38   :  { %371 = vmatprep.subr.bf16.mxu0 %v542_v0  ;;  %387 = vmatprep.mubr.msk.bf16.mxu0 %vm543_vm0, %v542_v0  ;;  %v423_v3 = vld [vmem:[#allocation6 + $0x10] sm:$0xff]   ;;  %v424_v4 = vld [vmem:[#allocation6 + $0x18] sm:$0xff]   ;;  %v425_v5 = vld [vmem:[#allocation6 + $0x20] sm:$0xff]   ;;  %s544_s8 = smov [#allocation9]  }
  0x39   :  { %391 = vmatprep.subr.bf16.mxu1 %v542_v0  ;;  %407 = vmatprep.mubr.msk.bf16.mxu1 %vm543_vm0, %v542_v0  ;;  %v426_v6 = vld [vmem:[#allocation6 + $0x28] sm:$0xff]   ;;  %v427_v7 = vld [vmem:[#allocation6 + $0x30] sm:$0xff]   ;;  %v428_v8 = vld [vmem:[#allocation6 + $0x38] sm:$0xff]   ;;  %s322_s9 = sshll.u32 %s544_s8, 4  ;;  %s323_s9 = int_to_ptr.vmem [resolvable:$true] %s322_s9 }
  0x3a   :  { %372 = vmatpush3.bf16.msra.mxu0 %v421_v1  ;;  %v67_v9 = vld [vmem:[#allocation3] sm:$0xff]  ;;  %v68_v10 = vld [vmem:[#allocation3 + $0x8] sm:$0xff]  ;;  %v429_v12 = vld [vmem:[#allocation8] sm:$0xff]   ;;  %s507_s10 = scalar_lea.vmem %s323_s9, 256  ;;  %p512_p11 = scmp.lt.s32.totalorder %s323_s9, %s323_s9 }
  0x3b   :  { %373 = vmatprep.subr.bf16.mxu0 %v542_v0  ;;  %v69_v11 = vpack.c.bf16 %v68_v10, %v67_v9  ;;  %392 = vmatpush3.bf16.msra.mxu1 %v429_v12  ;;  %v430_v13 = vld [vmem:[#allocation8 + $0x8] sm:$0xff]   ;;  %v431_v14 = vld [vmem:[#allocation8 + $0x10] sm:$0xff]   ;;  %v432_v15 = vld [vmem:[#allocation8 + $0x18] sm:$0xff]   ;;  %p508_p10 = scmp.ne.s32.totalorder %s323_s9, %s507_s10  ;;  %p513_p12 = scmp.lt.s32.totalorder %s507_s10, %s507_s10 }
  0x3c   :  { %393 = vmatprep.subr.bf16.mxu1 %v542_v0  ;;  %v433_v16 = vld [vmem:[#allocation8 + $0x20] sm:$0xff]   ;;  %v434_v17 = vld [vmem:[#allocation8 + $0x28] sm:$0xff]   ;;  %v435_v18 = vld [vmem:[#allocation8 + $0x30] sm:$0xff]  }
  0x3d   :  { %v436_v19 = vld [vmem:[#allocation8 + $0x38] sm:$0xff]   ;;  %v335_v20 = vld [vmem:[%s643_s2] ss:$0 sm:$0xff]  ;;  %p514_p13 = por %p513_p12, %p512_p11 }
  0x3e   :  { %374 = vmatpush3.bf16.msra.mxu0 %v422_v2  ;;  %v344_v46 = vld [vmem:[%s645_s4] ss:$0 sm:$0xff] }
  0x3f   :  { %375 = vmatprep.subr.bf16.mxu0 %v542_v0  ;;  %394 = vmatpush3.bf16.msra.mxu1 %v430_v13  ;;  %p515_p0 = pnand %p514_p13, %p508_p10 }
  0x40   :  { %395 = vmatprep.subr.bf16.mxu1 %v542_v0 }
  0x42   :  { %376 = vmatpush3.bf16.msra.mxu0 %v423_v3 }
  0x43   :  { %377 = vmatprep.subr.bf16.mxu0 %v542_v0  ;;  %396 = vmatpush3.bf16.msra.mxu1 %v431_v14 }
  0x44   :  { %397 = vmatprep.subr.bf16.mxu1 %v542_v0 }
  0x46   :  { %378 = vmatpush3.bf16.msra.mxu0 %v424_v4 }
  0x47   :  { %379 = vmatprep.subr.bf16.mxu0 %v542_v0  ;;  %398 = vmatpush3.bf16.msra.mxu1 %v432_v15 }
  0x48   :  { %399 = vmatprep.subr.bf16.mxu1 %v542_v0 }
  0x4a   :  { %380 = vmatpush3.bf16.msra.mxu0 %v425_v5 }
  0x4b   :  { %381 = vmatprep.subr.bf16.mxu0 %v542_v0  ;;  %400 = vmatpush3.bf16.msra.mxu1 %v433_v16 }
  0x4c   :  { %401 = vmatprep.subr.bf16.mxu1 %v542_v0 }
  0x4e   :  { %382 = vmatpush3.bf16.msra.mxu0 %v426_v6 }
  0x4f   :  { %383 = vmatprep.subr.bf16.mxu0 %v542_v0  ;;  %402 = vmatpush3.bf16.msra.mxu1 %v434_v17 }
  0x50   :  { %403 = vmatprep.subr.bf16.mxu1 %v542_v0 }
  0x52   :  { %384 = vmatpush3.bf16.msra.mxu0 %v427_v7 }
  0x53   :  { %385 = vmatprep.subr.bf16.mxu0 %v542_v0  ;;  %404 = vmatpush3.bf16.msra.mxu1 %v435_v18 }
  0x54   :  { %405 = vmatprep.subr.bf16.mxu1 %v542_v0 }
  0x56   :  { %386 = vmatpush3.bf16.msra.mxu0 %v428_v8 }
  0x57   :  { %406 = vmatpush3.bf16.msra.mxu1 %v436_v19 }
  0x59   :  { %388 = vmatmul.mubr.bf16.vlgmr.msra.gmra.mrb[0].mxu0 %v69_v11 }
 0x12c   :  { %v175_v21 = vpop.f32.mrb[0].mxu0 }
 0x12d   :  { %v176_v22 = vadd.f32 %v335_v20, %v175_v21  ;;  %v389_v23 = vpop.f32.mrb[1].mxu0 }
 0x12e   :  { %v178_v24 = vpop.f32.mrb[2].mxu0 }
 0x12f   :  { %v182_v25 = vmul.f32 %v176_v22, %v176_v22  ;;  %v179_v26 = vadd.f32 %v335_v20, %v178_v24  ;;  %v390_v27 = vpop.f32.mrb[3].mxu0 }
 0x131   :  { %v184_v28 = vmul.f32 %v182_v25, %v176_v22  ;;  %v183_v29 = vmul.f32 %v179_v26, %v179_v26 }
 0x133   :  { %v186_v30 = vmul.f32 0.044715, %v184_v28  ;;  %v185_v31 = vmul.f32 %v183_v29, %v179_v26 }
 0x135   :  { %v188_v32 = vadd.f32 %v186_v30, %v176_v22  ;;  %v187_v33 = vmul.f32 0.044715, %v185_v31 }
 0x137   :  { %v190_v34 = vmul.f32 0.7978846, %v188_v32  ;;  %v189_v35 = vadd.f32 %v187_v33, %v179_v26 }
 0x139   :  { %437 = vtanh.f32 %v190_v34  ;;  %v191_v36 = vmul.f32 0.7978846, %v189_v35 }
 0x13b   :  { %439 = vtanh.f32 %v191_v36 }
 0x143   :  { %v438_v37 = vpop.eup %437 }
 0x144   :  { %v194_v38 = vadd.f32 1.0, %v438_v37 }
 0x145   :  { %v440_v39 = vpop.eup %439 }
 0x146   :  { %v195_v40 = vadd.f32 1.0, %v440_v39  ;;  %v196_v41 = vmul.f32 0.5, %v194_v38 }
 0x148   :  { %v197_v42 = vmul.f32 0.5, %v195_v40  ;;  %v198_v43 = vmul.f32 %v196_v41, %v176_v22 }
 0x14a   :  { %v199_v44 = vmul.f32 %v197_v42, %v179_v26 }
 0x14c   :  { %v200_v45 = vpack.c.bf16 %v199_v44, %v198_v43 }
 0x14e   :  { %408 = vmatmul.mubr.bf16.vlgmr.msra.gmra.mrb[0].mxu1 %v200_v45 }
 0x221   :  { %v308_v47 = vpop.f32.mrb[0].mxu1 }
 0x222   :  { %v309_v48 = vadd.f32 %v344_v46, %v308_v47  ;;  %v409_v49 = vpop.f32.mrb[1].mxu1 }
 0x223   :  { %v311_v50 = vpop.f32.mrb[2].mxu1 }
 0x224   :  { %315 = vst [vmem:[#allocation9] sm:$0xff] %v309_v48  ;;  %v312_v51 = vadd.f32 %v344_v46, %v311_v50  ;;  %v410_v52 = vpop.f32.mrb[3].mxu1 }
 0x226   :  { %316 = vst [vmem:[#allocation9 + $0x8] sm:$0xff] %v312_v51 }
 0x227   :  { %518 = shalt.err (!%p515_p0)
}
 0x228   :  { %s519_s12 = scalar_lea.hbm %s646_s5, 256 }
 0x229   :  { %p520_p1 = scmp.ne.s32.totalorder %s646_s5, %s519_s12  ;;  %p523_p2 = scmp.lt.u32.totalorder %s519_s12, %s646_s5 }
 0x22b   :  { %p525_p3 = pnand %p523_p2, %p520_p1 }
 0x22d   :  { %528 = shalt.err (!%p525_p3)
}
 0x22e   :  { %328 = dma.vmem_to_hbm [thread:$0]  %s323_s9, 256, %s646_s5, [#allocation5], %s539_s1, %s539_s1, %s540_s17  }
 0x22f   :  { %533 = dma.done.wait [#allocation5], 256  }
 0x230   :  { %534 = vsyncadd [#allocation5], 4294967040 }
 0x231   :  { %332 = vsyncpa [#allocation4], 1 }
 0x232   :  { %333 = vsyncpa [#allocation7], 1 }
 0x233   :  { %334 = vsyncpa [#allocation5], 1 }

</bundles_post_ra>
